<compile_context>
chip_gen: v5e
topology: v5e:2x2
jax: 0.10.0
libtpu: 0.0.40
codegen_flags: <defaults>
</compile_context>

<pallas_src>
import functools

import jax
import jax.numpy as jnp
from jax.experimental import pallas as pl
from jax.experimental.pallas import tpu as pltpu

NFM_DROPOUT = 0.4          # TODO(synk): dropout treated as identity (eval-mode forward)
SPARSE_THRESHOLD = None
TOP_N_FEATURES = 100
USE_LINEAR_COMPONENT = True

LANE = 128


def _round_up(n, m):
    return ((n + m - 1) // m) * m


def _nfm_kernel(x_ref, ew_ref, e2_ref, w1_ref, b1_ref, w2_ref, b2_ref, bl_ref,
                o_ref, acc_xw_ref, acc_sq_ref, *, d_pad):
    """Grid = (batch tiles, F-reduction tiles).  Accumulate over F, finalize at last k."""
    k = pl.program_id(1)

    @pl.when(k == 0)
    def _():
        acc_xw_ref[...] = jnp.zeros_like(acc_xw_ref)
        acc_sq_ref[...] = jnp.zeros_like(acc_sq_ref)

    x = x_ref[...]
    # One wide MXU pass: columns [0:DP] accumulate sum_i x_i*e_i, columns [DP:] x@W_lin.
    acc_xw_ref[...] += jnp.dot(x, ew_ref[...], preferred_element_type=jnp.float32)
    # Second pass: sum_i (x_i*e_i)^2 = (x*x) @ (E*E)  (E*E precomputed in wrapper).
    acc_sq_ref[...] += jnp.dot(x * x, e2_ref[...], preferred_element_type=jnp.float32)

    @pl.when(k == pl.num_programs(1) - 1)
    def _():
        sum_emb = acc_xw_ref[:, :d_pad]            # [TM, DP]  (f32)
        lin_out = acc_xw_ref[:, d_pad:]            # [TM, OP]  (f32)
        sum_sq = acc_sq_ref[...]                   # [TM, DP]  (f32)
        interaction = 0.5 * (sum_emb * sum_emb - sum_sq)
        h = jnp.dot(interaction, w1_ref[...],
                    preferred_element_type=jnp.float32) + b1_ref[...]
        h = jnp.maximum(h, 0.0)
        inter_out = jnp.dot(h, w2_ref[...],
                            preferred_element_type=jnp.float32) + b2_ref[...]
        o_ref[...] = (lin_out + bl_ref[...] + inter_out).astype(o_ref.dtype)


def nfm_forward(x, params, *, use_bf16=False, tile_m=256, tile_k=1024):
    """x: [B, F] float32.  params: dict of weights (feature axis first, see init_params)."""
    B, F = x.shape
    emb, w_lin, b_lin = params["emb"], params["w_lin"], params["b_lin"]
    w1, b1, w2, b2 = params["w1"], params["b1"], params["w2"], params["b2"]
    D = emb.shape[1]
    O = w2.shape[1]

    # --- TOP_N_FEATURES sparsification (glue, matches torch.topk + scatter_) ---
    if TOP_N_FEATURES is not None and TOP_N_FEATURES < F:
        top_vals, top_idx = jax.lax.top_k(x, TOP_N_FEATURES)
        x = jnp.zeros_like(x).at[jnp.arange(B)[:, None], top_idx].set(top_vals)
    # TODO(synk): for large SAE dictionaries (F >> top-k), a gather-based sparse
    # kernel (scalar-prefetch indices, [B,100]@[100,D]) would cut HBM/MXU work ~F/100x.

    # --- lane / MXU friendly padding + tile selection ---
    DP = _round_up(D, LANE)
    OP = _round_up(O, LANE)
    TM = min(_round_up(B, 8), tile_m)
    BP = _round_up(B, TM)
    TK = min(_round_up(F, LANE), tile_k)
    FP = _round_up(F, TK)

    f32 = jnp.float32
    x_p = jnp.pad(x.astype(f32), ((0, BP - B), (0, FP - F)))
    E_p = jnp.pad(emb.astype(f32), ((0, FP - F), (0, DP - D)))
    Wl_p = jnp.pad(w_lin.astype(f32), ((0, FP - F), (0, OP - O)))
    ew = jnp.concatenate([E_p, Wl_p], axis=1)       # [FP, DP+OP]  fused RHS
    e2 = E_p * E_p                                  # [FP, DP]     precomputed once
    w1_p = jnp.pad(w1.astype(f32), ((0, DP - D), (0, DP - D)))
    b1_p = jnp.pad(b1.astype(f32), ((0, 0), (0, DP - D)))
    w2_p = jnp.pad(w2.astype(f32), ((0, DP - D), (0, OP - O)))
    b2_p = jnp.pad(b2.astype(f32), ((0, 0), (0, OP - O)))
    bl_p = jnp.pad(b_lin.astype(f32), ((0, 0), (0, OP - O)))

    if use_bf16:
        # Stream the big operands in bf16; squaring/subtraction/accumulation stay f32.
        x_p = x_p.astype(jnp.bfloat16)
        ew = ew.astype(jnp.bfloat16)
        e2 = e2.astype(jnp.bfloat16)

    n_b = BP // TM
    n_k = FP // TK
    itemsize = jnp.dtype(x_p.dtype).itemsize

    # VMEM budget: double-buffered streamed tiles + resident weights + scratch + headroom,
    # clamped so it stays friendly to v7x's 64 MiB physical VMEM.
    stream = 2 * (TM * TK + TK * (DP + OP) + TK * DP) * itemsize
    resident = (DP * DP + DP * OP + 2 * DP + 2 * OP) * 4 + 2 * TM * OP * 4
    scratch = TM * (2 * DP + OP) * 4
    vmem_bytes = int(min(max(stream + resident + scratch + (4 << 20), 16 << 20), 48 << 20))

    kernel = functools.partial(_nfm_kernel, d_pad=DP)

    out_p = pl.pallas_call(
        kernel,
        out_shape=jax.ShapeDtypeStruct((BP, OP), jnp.float32),
        grid=(n_b, n_k),
        in_specs=[
            pl.BlockSpec((TM, TK), lambda i, k: (i, k)),        # x tile
            pl.BlockSpec((TK, DP + OP), lambda i, k: (k, 0)),   # [E | W_lin] tile (streamed)
            pl.BlockSpec((TK, DP), lambda i, k: (k, 0)),        # E*E tile (streamed)
            pl.BlockSpec((DP, DP), lambda i, k: (0, 0)),        # W1 (grid-invariant)
            pl.BlockSpec((1, DP), lambda i, k: (0, 0)),         # b1
            pl.BlockSpec((DP, OP), lambda i, k: (0, 0)),        # W2
            pl.BlockSpec((1, OP), lambda i, k: (0, 0)),         # b2
            pl.BlockSpec((1, OP), lambda i, k: (0, 0)),         # b_lin
        ],
        out_specs=pl.BlockSpec((TM, OP), lambda i, k: (i, 0)),
        scratch_shapes=[
            pltpu.VMEM((TM, DP + OP), jnp.float32),   # [sum_emb | lin_out] accumulator
            pltpu.VMEM((TM, DP), jnp.float32),        # sum_sq accumulator
        ],
        compiler_params=pltpu.CompilerParams(
            dimension_semantics=("parallel", "arbitrary"),
            vmem_limit_bytes=vmem_bytes,
        ),
    )(x_p, ew, e2, w1_p, b1_p, w2_p, b2_p, bl_p)

    return out_p[:B, :O].astype(x.dtype)


def init_params(key, num_sae_features, embedding_dim, output_dim):
    """Deterministic init matching the module: normal(std) weights, zero biases."""
    k_emb, k_lin, k_w1, k_w2 = jax.random.split(key, 4)
    return {
        "emb": 0.05 * jax.random.normal(k_emb, (num_sae_features, embedding_dim), jnp.float32),
        "w_lin": 0.01 * jax.random.normal(k_lin, (num_sae_features, output_dim), jnp.float32),
        "b_lin": jnp.zeros((1, output_dim), jnp.float32),
        "w1": 0.01 * jax.random.normal(k_w1, (embedding_dim, embedding_dim), jnp.float32),
        "b1": jnp.zeros((1, embedding_dim), jnp.float32),
        "w2": 0.01 * jax.random.normal(k_w2, (embedding_dim, output_dim), jnp.float32),
        "b2": jnp.zeros((1, output_dim), jnp.float32),
    }


def nfm_reference(x, params):
    """Pure-JAX reference of the PyTorch forward (eval mode)."""
    B, F = x.shape
    if TOP_N_FEATURES is not None and TOP_N_FEATURES < F:
        top_vals, top_idx = jax.lax.top_k(x, TOP_N_FEATURES)
        x = jnp.zeros_like(x).at[jnp.arange(B)[:, None], top_idx].set(top_vals)
    E = params["emb"]
    weighted = x[:, :, None] * E[None, :, :]
    sum_emb = weighted.sum(axis=1)
    sum_sq = (weighted ** 2).sum(axis=1)
    inter = 0.5 * (sum_emb ** 2 - sum_sq)
    h = jnp.maximum(inter @ params["w1"] + params["b1"], 0.0)
    inter_out = h @ params["w2"] + params["b2"]
    lin_out = x @ params["w_lin"] + params["b_lin"]
    return lin_out + inter_out


if __name__ == "__main__":
    B, F, D, O = 8, 128, 32, 16   # batch, num_sae_features, embedding_dim, output_dim

    key = jax.random.PRNGKey(0)
    k_params, k_x = jax.random.split(key)
    params = init_params(k_params, F, D, O)
    # SAE features are activations -> non-negative
    x = jax.nn.relu(jax.random.normal(k_x, (B, F), jnp.float32))

    out = nfm_forward(x, params)
    out = jax.block_until_ready(out)

    ref = nfm_reference(x, params)
    assert out.shape == (B, O)
    assert jnp.allclose(out, ref, atol=1e-5, rtol=1e-4), "mismatch vs reference"

    print("KERNEL_OK")
</pallas_src>

<mosaic_0001>
module attributes {stable_mosaic.version = 11 : i64} {
  func.func @_nfm_kernel(%arg0: i32, %arg1: i32, %arg2: memref<8x128xf32, #tpu.memory_space<vmem>>, %arg3: memref<128x256xf32, #tpu.memory_space<vmem>>, %arg4: memref<128x128xf32, #tpu.memory_space<vmem>>, %arg5: memref<128x128xf32, #tpu.memory_space<vmem>>, %arg6: memref<1x128xf32, #tpu.memory_space<vmem>>, %arg7: memref<128x128xf32, #tpu.memory_space<vmem>>, %arg8: memref<1x128xf32, #tpu.memory_space<vmem>>, %arg9: memref<1x128xf32, #tpu.memory_space<vmem>>, %arg10: memref<8x128xf32, #tpu.memory_space<vmem>>, %arg11: memref<8x256xf32, #tpu.memory_space<vmem>>, %arg12: memref<8x128xf32, #tpu.memory_space<vmem>>) attributes {dimension_semantics = [#tpu.dimension_semantics<parallel>, #tpu.dimension_semantics<arbitrary>], iteration_bounds = array<i64: 1, 1>, scalar_prefetch = 0 : i64, scratch_operands = 2 : i64, tpu.core_type = #tpu.core_type<tc>, window_params = [{transform_indices = @transform_0, window_bounds = array<i64: 8, 128>}, {transform_indices = @transform_1, window_bounds = array<i64: 128, 256>}, {transform_indices = @transform_2, window_bounds = array<i64: 128, 128>}, {pipeline_mode = #tpu.pipeline_mode<synchronous>, transform_indices = @transform_3, window_bounds = array<i64: 128, 128>}, {pipeline_mode = #tpu.pipeline_mode<synchronous>, transform_indices = @transform_4, window_bounds = array<i64: 1, 128>}, {pipeline_mode = #tpu.pipeline_mode<synchronous>, transform_indices = @transform_5, window_bounds = array<i64: 128, 128>}, {pipeline_mode = #tpu.pipeline_mode<synchronous>, transform_indices = @transform_6, window_bounds = array<i64: 1, 128>}, {pipeline_mode = #tpu.pipeline_mode<synchronous>, transform_indices = @transform_7, window_bounds = array<i64: 1, 128>}, {transform_indices = @transform_8, window_bounds = array<i64: 8, 128>}]} {
    %c0_i32 = arith.constant 0 : i32
    %0 = arith.cmpi eq, %arg1, %c0_i32 : i32
    %1 = arith.extui %0 : i1 to i32
    %c0_i32_0 = arith.constant 0 : i32
    %2 = arith.cmpi ne, %1, %c0_i32_0 : i32
    scf.if %2 {
      %cst_17 = arith.constant 0.000000e+00 : f32
      %18 = vector.broadcast %cst_17 : f32 to vector<8x256xf32>
      %c0_18 = arith.constant 0 : index
      %c0_19 = arith.constant 0 : index
      %19 = vector.load %arg11[%c0_18, %c0_19] : memref<8x256xf32, #tpu.memory_space<vmem>>, vector<8x256xf32>
      tpu.vector_store %arg11[%c0_18, %c0_19], %18 {strides = array<i32>} : memref<8x256xf32, #tpu.memory_space<vmem>>, vector<8x256xf32>,
      %cst_20 = arith.constant 0.000000e+00 : f32
      %20 = vector.broadcast %cst_20 : f32 to vector<8x128xf32>
      %c0_21 = arith.constant 0 : index
      %c0_22 = arith.constant 0 : index
      %21 = vector.load %arg12[%c0_21, %c0_22] : memref<8x128xf32, #tpu.memory_space<vmem>>, vector<8x128xf32>
      tpu.vector_store %arg12[%c0_21, %c0_22], %20 {strides = array<i32>} : memref<8x128xf32, #tpu.memory_space<vmem>>, vector<8x128xf32>,
    } else {
    }
    %c0 = arith.constant 0 : index
    %c0_1 = arith.constant 0 : index
    %3 = vector.load %arg2[%c0, %c0_1] : memref<8x128xf32, #tpu.memory_space<vmem>>, vector<8x128xf32>
    %c0_2 = arith.constant 0 : index
    %c0_3 = arith.constant 0 : index
    %4 = vector.load %arg11[%c0_2, %c0_3] : memref<8x256xf32, #tpu.memory_space<vmem>>, vector<8x256xf32>
    %c0_4 = arith.constant 0 : index
    %c0_5 = arith.constant 0 : index
    %5 = vector.load %arg3[%c0_4, %c0_5] : memref<128x256xf32, #tpu.memory_space<vmem>>, vector<128x256xf32>
    %cst = arith.constant dense<0.000000e+00> : vector<8x256xf32>
    %6 = tpu.matmul %3, %5, %cst {dimension_numbers = #tpu.dot_dimension_numbers<[1], [0], [0], [1], [0, 0, 1, 1], [], []>} : vector<8x128xf32>, vector<128x256xf32>, vector<8x256xf32> -> vector<8x256xf32>
    %7 = arith.addf %4, %6 : vector<8x256xf32>
    %c0_6 = arith.constant 0 : index
    %c0_7 = arith.constant 0 : index
    %8 = vector.load %arg11[%c0_6, %c0_7] : memref<8x256xf32, #tpu.memory_space<vmem>>, vector<8x256xf32>
    tpu.vector_store %arg11[%c0_6, %c0_7], %7 {strides = array<i32>} : memref<8x256xf32, #tpu.memory_space<vmem>>, vector<8x256xf32>,
    %c0_8 = arith.constant 0 : index
    %c0_9 = arith.constant 0 : index
    %9 = vector.load %arg12[%c0_8, %c0_9] : memref<8x128xf32, #tpu.memory_space<vmem>>, vector<8x128xf32>
    %10 = arith.mulf %3, %3 : vector<8x128xf32>
    %c0_10 = arith.constant 0 : index
    %c0_11 = arith.constant 0 : index
    %11 = vector.load %arg4[%c0_10, %c0_11] : memref<128x128xf32, #tpu.memory_space<vmem>>, vector<128x128xf32>
    %cst_12 = arith.constant dense<0.000000e+00> : vector<8x128xf32>
    %12 = tpu.matmul %10, %11, %cst_12 {dimension_numbers = #tpu.dot_dimension_numbers<[1], [0], [0], [1], [0, 0, 1, 1], [], []>} : vector<8x128xf32>, vector<128x128xf32>, vector<8x128xf32> -> vector<8x128xf32>
    %13 = arith.addf %9, %12 : vector<8x128xf32>
    %c0_13 = arith.constant 0 : index
    %c0_14 = arith.constant 0 : index
    %14 = vector.load %arg12[%c0_13, %c0_14] : memref<8x128xf32, #tpu.memory_space<vmem>>, vector<8x128xf32>
    tpu.vector_store %arg12[%c0_13, %c0_14], %13 {strides = array<i32>} : memref<8x128xf32, #tpu.memory_space<vmem>>, vector<8x128xf32>,
    %c0_i32_15 = arith.constant 0 : i32
    %15 = arith.cmpi eq, %arg1, %c0_i32_15 : i32
    %16 = arith.extui %15 : i1 to i32
    %c0_i32_16 = arith.constant 0 : i32
    %17 = arith.cmpi ne, %16, %c0_i32_16 : i32
    scf.if %17 {
      %c0_17 = arith.constant 0 : index
      %c0_18 = arith.constant 0 : index
      %18 = vector.load %arg11[%c0_17, %c0_18] : memref<8x256xf32, #tpu.memory_space<vmem>>, vector<8x128xf32>
      %c0_19 = arith.constant 0 : index
      %c128 = arith.constant 128 : index
      %19 = vector.load %arg11[%c0_19, %c128] : memref<8x256xf32, #tpu.memory_space<vmem>>, vector<8x128xf32>
      %c0_20 = arith.constant 0 : index
      %c0_21 = arith.constant 0 : index
      %20 = vector.load %arg12[%c0_20, %c0_21] : memref<8x128xf32, #tpu.memory_space<vmem>>, vector<8x128xf32>
      %21 = arith.mulf %18, %18 : vector<8x128xf32>
      %22 = arith.subf %21, %20 : vector<8x128xf32>
      %cst_22 = arith.constant 5.000000e-01 : f32
      %23 = vector.broadcast %cst_22 : f32 to vector<8x128xf32>
      %24 = arith.mulf %23, %22 : vector<8x128xf32>
      %c0_23 = arith.constant 0 : index
      %c0_24 = arith.constant 0 : index
      %25 = vector.load %arg5[%c0_23, %c0_24] : memref<128x128xf32, #tpu.memory_space<vmem>>, vector<128x128xf32>
      %cst_25 = arith.constant dense<0.000000e+00> : vector<8x128xf32>
      %26 = tpu.matmul %24, %25, %cst_25 {dimension_numbers = #tpu.dot_dimension_numbers<[1], [0], [0], [1], [0, 0, 1, 1], [], []>} : vector<8x128xf32>, vector<128x128xf32>, vector<8x128xf32> -> vector<8x128xf32>
      %c0_26 = arith.constant 0 : index
      %c0_27 = arith.constant 0 : index
      %27 = vector.load %arg6[%c0_26, %c0_27] : memref<1x128xf32, #tpu.memory_space<vmem>>, vector<1x128xf32>
      %28 = vector.broadcast %27 : vector<1x128xf32> to vector<8x128xf32>
      %29 = arith.addf %26, %28 : vector<8x128xf32>
      %cst_28 = arith.constant 0.000000e+00 : f32
      %30 = vector.broadcast %cst_28 : f32 to vector<8x128xf32>
      %31 = arith.maximumf %29, %30 : vector<8x128xf32>
      %c0_29 = arith.constant 0 : index
      %c0_30 = arith.constant 0 : index
      %32 = vector.load %arg7[%c0_29, %c0_30] : memref<128x128xf32, #tpu.memory_space<vmem>>, vector<128x128xf32>
      %cst_31 = arith.constant dense<0.000000e+00> : vector<8x128xf32>
      %33 = tpu.matmul %31, %32, %cst_31 {dimension_numbers = #tpu.dot_dimension_numbers<[1], [0], [0], [1], [0, 0, 1, 1], [], []>} : vector<8x128xf32>, vector<128x128xf32>, vector<8x128xf32> -> vector<8x128xf32>
      %c0_32 = arith.constant 0 : index
      %c0_33 = arith.constant 0 : index
      %34 = vector.load %arg8[%c0_32, %c0_33] : memref<1x128xf32, #tpu.memory_space<vmem>>, vector<1x128xf32>
      %35 = vector.broadcast %34 : vector<1x128xf32> to vector<8x128xf32>
      %36 = arith.addf %33, %35 : vector<8x128xf32>
      %c0_34 = arith.constant 0 : index
      %c0_35 = arith.constant 0 : index
      %37 = vector.load %arg9[%c0_34, %c0_35] : memref<1x128xf32, #tpu.memory_space<vmem>>, vector<1x128xf32>
      %38 = vector.broadcast %37 : vector<1x128xf32> to vector<8x128xf32>
      %39 = arith.addf %19, %38 : vector<8x128xf32>
      %40 = arith.addf %39, %36 : vector<8x128xf32>
      %c0_36 = arith.constant 0 : index
      %c0_37 = arith.constant 0 : index
      %41 = vector.load %arg10[%c0_36, %c0_37] : memref<8x128xf32, #tpu.memory_space<vmem>>, vector<8x128xf32>
      tpu.vector_store %arg10[%c0_36, %c0_37], %40 {strides = array<i32>} : memref<8x128xf32, #tpu.memory_space<vmem>>, vector<8x128xf32>,
    } else {
    }
    return
  }
  func.func @transform_0(%arg0: i32, %arg1: i32) -> (i32, i32) {
    %c0_i32 = arith.constant 0 : i32
    return %arg0, %arg1 : i32, i32
  }
  func.func @transform_1(%arg0: i32, %arg1: i32) -> (i32, i32) {
    %c0_i32 = arith.constant 0 : i32
    %c0_i32_0 = arith.constant 0 : i32
    return %arg1, %c0_i32 : i32, i32
  }
  func.func @transform_2(%arg0: i32, %arg1: i32) -> (i32, i32) {
    %c0_i32 = arith.constant 0 : i32
    %c0_i32_0 = arith.constant 0 : i32
    return %arg1, %c0_i32 : i32, i32
  }
  func.func @transform_3(%arg0: i32, %arg1: i32) -> (i32, i32) {
    %c0_i32 = arith.constant 0 : i32
    %c0_i32_0 = arith.constant 0 : i32
    %c0_i32_1 = arith.constant 0 : i32
    return %c0_i32, %c0_i32_0 : i32, i32
  }
  func.func @transform_4(%arg0: i32, %arg1: i32) -> (i32, i32) {
    %c0_i32 = arith.constant 0 : i32
    %c0_i32_0 = arith.constant 0 : i32
    %c0_i32_1 = arith.constant 0 : i32
    return %c0_i32, %c0_i32_0 : i32, i32
  }
  func.func @transform_5(%arg0: i32, %arg1: i32) -> (i32, i32) {
    %c0_i32 = arith.constant 0 : i32
    %c0_i32_0 = arith.constant 0 : i32
    %c0_i32_1 = arith.constant 0 : i32
    return %c0_i32, %c0_i32_0 : i32, i32
  }
  func.func @transform_6(%arg0: i32, %arg1: i32) -> (i32, i32) {
    %c0_i32 = arith.constant 0 : i32
    %c0_i32_0 = arith.constant 0 : i32
    %c0_i32_1 = arith.constant 0 : i32
    return %c0_i32, %c0_i32_0 : i32, i32
  }
  func.func @transform_7(%arg0: i32, %arg1: i32) -> (i32, i32) {
    %c0_i32 = arith.constant 0 : i32
    %c0_i32_0 = arith.constant 0 : i32
    %c0_i32_1 = arith.constant 0 : i32
    return %c0_i32, %c0_i32_0 : i32, i32
  }
  func.func @transform_8(%arg0: i32, %arg1: i32) -> (i32, i32) {
    %c0_i32 = arith.constant 0 : i32
    %c0_i32_0 = arith.constant 0 : i32
    return %arg0, %c0_i32 : i32, i32
  }
}

</mosaic_0001>

<bundles_post_ra>
// kernel: tpu_custom_call.1
= control target key start
LH: loop header
LB: loop body
LE: loop exit
PB: predicated region body
PF: predicated region fallthrough
CT: control target
= control target key end

     0   :  { %13 = vsyncpa [#allocation5], 0  ;;  %s601_s0 = inlined_call_operand.hbm [shape: f32[8,128], index: 0, kind: input, shape index: {}]   ;;  %s602_s1 = inlined_call_operand.hbm [shape: f32[128,256], index: 1, kind: input, shape index: {}]   ;;  %s603_s2 = inlined_call_operand.hbm [shape: f32[128,128], index: 2, kind: input, shape index: {}]   ;;  %s604_s3 = inlined_call_operand.hbm [shape: f32[128,128], index: 3, kind: input, shape index: {}]   ;;  %s605_s4 = inlined_call_operand.vmem [shape: f32[1,128], index: 4, kind: input, shape index: {}]   ;;  %s606_s5 = inlined_call_operand.hbm [shape: f32[128,128], index: 5, kind: input, shape index: {}]   ;;  %s607_s6 = inlined_call_operand.vmem [shape: f32[1,128], index: 6, kind: input, shape index: {}]   ;;  %s608_s7 = inlined_call_operand.vmem [shape: f32[1,128], index: 7, kind: input, shape index: {}]   ;;  %s609_s8 = inlined_call_operand.hbm [shape: f32[8,128], index: 8, kind: output, shape index: {}]  }
   0x1   :  { %14 = vsyncpa [#allocation8], 0 }
   0x2   :  { %15 = vsyncpa [#allocation11], 0  ;;  %s32_s29 = sshll.u32 %s602_s1, 4  ;;  %s33_s29 = int_to_ptr.hbm [resolvable:$true] %s32_s29 }
   0x3   :  { %16 = vsyncpa [#allocation6], 0  ;;  %s513_s30 = smov [#allocation7]   ;;  %s514_s10 = smov 256  }
   0x4   :  { %s34_s9 = sshll.u32 %s513_s30, 4  ;;  %s515_s11 = smov 16   ;;  %s35_s9 = int_to_ptr.vmem [resolvable:$true] %s34_s9 }
   0x5   :  { %40 = dma.hbm_to_vmem [thread:$0]  %s33_s29, 4096, %s35_s9, [#allocation8], %s514_s10, %s514_s10, %s515_s11  }
   0x6   :  { %s58_s14 = sshll.u32 %s604_s3, 4  ;;  %s516_s15 = smov [#allocation10]   ;;  %s59_s14 = int_to_ptr.hbm [resolvable:$true] %s58_s14 }
   0x7   :  { %s60_s16 = sshll.u32 %s516_s15, 4  ;;  %s22_s19 = sshll.u32 %s601_s0, 4  ;;  %s61_s16 = int_to_ptr.vmem [resolvable:$true] %s60_s16  ;;  %s23_s19 = int_to_ptr.hbm [resolvable:$true] %s22_s19 }
   0x8   :  { %s517_s1 = smov 128   ;;  %s518_s20 = smov 8  }
   0x9   :  { %66 = dma.hbm_to_vmem [thread:$0]  %s59_s14, 2048, %s61_s16, [#allocation11], %s517_s1, %s517_s1, %s518_s20  }
   0xa   :  { %s45_s23 = sshll.u32 %s603_s2, 4  ;;  %s519_s24 = smov [#allocation4]   ;;  %s46_s23 = int_to_ptr.hbm [resolvable:$true] %s45_s23 }
   0xb   :  { %s24_s25 = sshll.u32 %s519_s24, 4  ;;  %s520_s3 = smov [#allocation9]   ;;  %s25_s25 = int_to_ptr.vmem [resolvable:$true] %s24_s25 }
   0xc   :  { %27 = dma.hbm_to_vmem [thread:$0]  %s23_s19, 128, %s25_s25, [#allocation5]  }
   0xd   :  { %s47_s26 = sshll.u32 %s520_s3, 4  ;;  %s73_s0 = sshll.u32 %s606_s5, 4  ;;  %s48_s26 = int_to_ptr.vmem [resolvable:$true] %s47_s26  ;;  %s74_s0 = int_to_ptr.hbm [resolvable:$true] %s73_s0 }
   0xe   :  { %53 = dma.hbm_to_vmem [thread:$0]  %s46_s23, 2048, %s48_s26, [#allocation8], %s517_s1, %s517_s1, %s518_s20  }
   0xf   :  { %s521_s29 = smov [#allocation12]  }
  0x10   :  { %s75_s30 = sshll.u32 %s521_s29, 4  ;;  %s76_s30 = int_to_ptr.vmem [resolvable:$true] %s75_s30 }
  0x11   :  { %81 = dma.hbm_to_vmem [thread:$0]  %s74_s0, 2048, %s76_s30, [#allocation11], %s517_s1, %s517_s1, %s518_s20  }
  0x12   :  { %505 = dma.done.wait [#allocation5], 128  }
  0x13   :  { %506 = vsyncadd [#allocation5], 4294967168 }
  0x14   :  { %507 = dma.done.wait [#allocation8], 6144  }
  0x15   :  { %508 = vsyncadd [#allocation8], 4294961152 }
  0x16   :  { %509 = dma.done.wait [#allocation11], 4096  }
  0x17   :  { %510 = vsyncadd [#allocation11], 4294963200  ;;  %v209_v0 = vld [vmem:[#allocation9 + $0x78] sm:$0xff]  ;;  %v208_v1 = vld [vmem:[#allocation9 + $0x70] sm:$0xff]  ;;  %s522_s13 = smov [#allocation13]  }
  0x18   :  { %v146_v2 = vld [vmem:[#allocation7 + $0xf0] sm:$0xff]  ;;  %210 = vmatpush.msra.mxu2 %v209_v0  ;;  %v144_v3 = vld [vmem:[#allocation7 + $0xe0] sm:$0xff]  ;;  %v207_v4 = vld [vmem:[#allocation9 + $0x68] sm:$0xff]  ;;  %s334_s14 = sshll.u32 %s522_s13, 4  ;;  %s335_s14 = int_to_ptr.vmem [resolvable:$true] %s334_s14 }
  0x19   :  { %148 = vmatpush.msra.mxu0 %v146_v2  ;;  %v142_v5 = vld [vmem:[#allocation7 + $0xd0] sm:$0xff]  ;;  %v206_v6 = vld [vmem:[#allocation9 + $0x60] sm:$0xff]  ;;  %v205_v8 = vld [vmem:[#allocation9 + $0x58] sm:$0xff] }
  0x1a   :  { %211 = vmatpush.msra.mxu2 %v208_v1  ;;  %v140_v7 = vld [vmem:[#allocation7 + $0xc0] sm:$0xff]  ;;  %v138_v9 = vld [vmem:[#allocation7 + $0xb0] sm:$0xff]  ;;  %v203_v12 = vld [vmem:[#allocation9 + $0x48] sm:$0xff] }
  0x1b   :  { %149 = vmatpush.msra.mxu0 %v144_v3  ;;  %v204_v10 = vld [vmem:[#allocation9 + $0x50] sm:$0xff]  ;;  %v136_v11 = vld [vmem:[#allocation7 + $0xa0] sm:$0xff]  ;;  %v256_v14 = vld [vmem:[#allocation10 + $0x78] sm:$0xff] }
  0x1c   :  { %212 = vmatpush.msra.mxu2 %v207_v4  ;;  %v134_v13 = vld [vmem:[#allocation7 + $0x90] sm:$0xff]  ;;  %v202_v16 = vld [vmem:[#allocation9 + $0x40] sm:$0xff]  ;;  %261 = vmatpush.msra.mxu3 %v256_v14  ;;  %v254_v18 = vld [vmem:[#allocation10 + $0x68] sm:$0xff] }
  0x1d   :  { %150 = vmatpush.msra.mxu0 %v142_v5  ;;  %v255_v15 = vld [vmem:[#allocation10 + $0x70] sm:$0xff]  ;;  %v132_v17 = vld [vmem:[#allocation7 + $0x80] sm:$0xff]  ;;  %v201_v19 = vld [vmem:[#allocation9 + $0x38] sm:$0xff] }
  0x1e   :  { %213 = vmatpush.msra.mxu2 %v206_v6  ;;  %v130_v20 = vld [vmem:[#allocation7 + $0x70] sm:$0xff]  ;;  %262 = vmatpush.msra.mxu3 %v255_v15  ;;  %v253_v21 = vld [vmem:[#allocation10 + $0x60] sm:$0xff]  ;;  %v252_v24 = vld [vmem:[#allocation10 + $0x58] sm:$0xff] }
  0x1f   :  { %151 = vmatpush.msra.mxu0 %v140_v7  ;;  %v200_v22 = vld [vmem:[#allocation9 + $0x30] sm:$0xff]  ;;  %v128_v23 = vld [vmem:[#allocation7 + $0x60] sm:$0xff]  ;;  %v199_v25 = vld [vmem:[#allocation9 + $0x28] sm:$0xff] }
  0x20   :  { %214 = vmatpush.msra.mxu2 %v205_v8  ;;  %263 = vmatpush.msra.mxu3 %v254_v18  ;;  %v126_v26 = vld [vmem:[#allocation7 + $0x50] sm:$0xff]  ;;  %v198_v28 = vld [vmem:[#allocation9 + $0x20] sm:$0xff]  ;;  %v250_v30 = vld [vmem:[#allocation10 + $0x48] sm:$0xff] }
  0x21   :  { %152 = vmatpush.msra.mxu0 %v138_v9  ;;  %v251_v27 = vld [vmem:[#allocation10 + $0x50] sm:$0xff]  ;;  %v124_v29 = vld [vmem:[#allocation7 + $0x40] sm:$0xff]  ;;  %v197_v31 = vld [vmem:[#allocation9 + $0x18] sm:$0xff] }
  0x22   :  { %215 = vmatpush.msra.mxu2 %v204_v10  ;;  %264 = vmatpush.msra.mxu3 %v253_v21  ;;  %v122_v32 = vld [vmem:[#allocation7 + $0x30] sm:$0xff]  ;;  %v249_v33 = vld [vmem:[#allocation10 + $0x40] sm:$0xff]  ;;  %v583_v36 = vld [vmem:[#allocation4] sm:$0xff] }
  0x23   :  { %153 = vmatpush.msra.mxu0 %v136_v11  ;;  %v196_v34 = vld [vmem:[#allocation9 + $0x10] sm:$0xff]  ;;  %v120_v35 = vld [vmem:[#allocation7 + $0x20] sm:$0xff]  ;;  %v248_v37 = vld [vmem:[#allocation10 + $0x38] sm:$0xff]  ;;  %v193_v42 = vmul.f32 %v583_v36, %v583_v36 }
  0x24   :  { %216 = vmatpush.msra.mxu2 %v203_v12  ;;  %265 = vmatpush.msra.mxu3 %v252_v24  ;;  %v195_v38 = vld [vmem:[#allocation9 + $0x8] sm:$0xff]  ;;  %v118_v39 = vld [vmem:[#allocation7 + $0x10] sm:$0xff]  ;;  %v194_v41 = vld [vmem:[#allocation9] sm:$0xff] }
  0x25   :  { %154 = vmatpush.msra.mxu0 %v134_v13  ;;  %v247_v40 = vld [vmem:[#allocation10 + $0x30] sm:$0xff]  ;;  %v116_v43 = vld [vmem:[#allocation7] sm:$0xff]  ;;  %v246_v44 = vld [vmem:[#allocation10 + $0x28] sm:$0xff] }
  0x26   :  { %217 = vmatpush.msra.mxu2 %v202_v16  ;;  %266 = vmatpush.msra.mxu3 %v251_v27  ;;  %v245_v45 = vld [vmem:[#allocation10 + $0x20] sm:$0xff]  ;;  %v244_v46 = vld [vmem:[#allocation10 + $0x18] sm:$0xff]  ;;  %v243_v47 = vld [vmem:[#allocation10 + $0x10] sm:$0xff] }
  0x27   :  { %155 = vmatpush.msra.mxu0 %v132_v17  ;;  %v242_v48 = vld [vmem:[#allocation10 + $0x8] sm:$0xff]  ;;  %v241_v49 = vld [vmem:[#allocation10] sm:$0xff]  ;;  %v147_v50 = vld [vmem:[#allocation7 + $0xf8] sm:$0xff] }
  0x28   :  { %218 = vmatpush.msra.mxu2 %v201_v19  ;;  %267 = vmatpush.msra.mxu3 %v250_v30  ;;  %v297_v51 = vld [vmem:[#allocation12 + $0x78] sm:$0xff]  ;;  %v145_v52 = vld [vmem:[#allocation7 + $0xe8] sm:$0xff]  ;;  %v296_v53 = vld [vmem:[#allocation12 + $0x70] sm:$0xff] }
  0x29   :  { %156 = vmatpush.msra.mxu0 %v130_v20  ;;  %168 = vmatpush.msra.mxu1 %v147_v50  ;;  %v143_v54 = vld [vmem:[#allocation7 + $0xd8] sm:$0xff]  ;;  %v295_v55 = vld [vmem:[#allocation12 + $0x68] sm:$0xff]  ;;  %v294_v57 = vld [vmem:[#allocation12 + $0x60] sm:$0xff] }
  0x2a   :  { %219 = vmatpush.msra.mxu2 %v200_v22  ;;  %268 = vmatpush.msra.mxu3 %v249_v33  ;;  %v141_v56 = vld [vmem:[#allocation7 + $0xc8] sm:$0xff]  ;;  %v139_v58 = vld [vmem:[#allocation7 + $0xb8] sm:$0xff]  ;;  %v292_v61 = vld [vmem:[#allocation12 + $0x50] sm:$0xff] }
  0x2b   :  { %157 = vmatpush.msra.mxu0 %v128_v23  ;;  %169 = vmatpush.msra.mxu1 %v145_v52  ;;  %v293_v59 = vld [vmem:[#allocation12 + $0x58] sm:$0xff]  ;;  %v137_v60 = vld [vmem:[#allocation7 + $0xa8] sm:$0xff]  ;;  %v290_v1 = vld [vmem:[#allocation12 + $0x40] sm:$0xff] }
  0x2c   :  { %220 = vmatpush.msra.mxu2 %v199_v25  ;;  %269 = vmatpush.msra.mxu3 %v248_v37  ;;  %v135_v62 = vld [vmem:[#allocation7 + $0x98] sm:$0xff]  ;;  %v291_v63 = vld [vmem:[#allocation12 + $0x48] sm:$0xff]  ;;  %v288_v5 = vld [vmem:[#allocation12 + $0x30] sm:$0xff] }
  0x2d   :  { %158 = vmatpush.msra.mxu0 %v126_v26  ;;  %170 = vmatpush.msra.mxu1 %v143_v54  ;;  %v133_v0 = vld [vmem:[#allocation7 + $0x88] sm:$0xff]  ;;  %v131_v2 = vld [vmem:[#allocation7 + $0x78] sm:$0xff]  ;;  %v286_v9 = vld [vmem:[#allocation12 + $0x20] sm:$0xff] }
  0x2e   :  { %221 = vmatpush.msra.mxu2 %v198_v28  ;;  %270 = vmatpush.msra.mxu3 %v247_v40  ;;  %v289_v3 = vld [vmem:[#allocation12 + $0x38] sm:$0xff]  ;;  %v129_v4 = vld [vmem:[#allocation7 + $0x68] sm:$0xff]  ;;  %v284_v18 = vld [vmem:[#allocation12 + $0x10] sm:$0xff] }
  0x2f   :  { %159 = vmatpush.msra.mxu0 %v124_v29  ;;  %171 = vmatpush.msra.mxu1 %v141_v56  ;;  %v127_v6 = vld [vmem:[#allocation7 + $0x58] sm:$0xff]  ;;  %v287_v7 = vld [vmem:[#allocation12 + $0x28] sm:$0xff]  ;;  %v282_v22 = vld [vmem:[#allocation12] sm:$0xff] }
  0x30   :  { %222 = vmatpush.msra.mxu2 %v197_v31  ;;  %271 = vmatpush.msra.mxu3 %v246_v44  ;;  %v125_v8 = vld [vmem:[#allocation7 + $0x48] sm:$0xff]  ;;  %v123_v11 = vld [vmem:[#allocation7 + $0x38] sm:$0xff] }
  0x31   :  { %160 = vmatpush.msra.mxu0 %v122_v32  ;;  %172 = vmatpush.msra.mxu1 %v139_v58  ;;  %v285_v12 = vld [vmem:[#allocation12 + $0x18] sm:$0xff]  ;;  %v121_v14 = vld [vmem:[#allocation7 + $0x28] sm:$0xff] }
  0x32   :  { %223 = vmatpush.msra.mxu2 %v196_v34  ;;  %272 = vmatpush.msra.mxu3 %v245_v45  ;;  %v119_v19 = vld [vmem:[#allocation7 + $0x18] sm:$0xff]  ;;  %v283_v20 = vld [vmem:[#allocation12 + $0x8] sm:$0xff] }
  0x33   :  { %161 = vmatpush.msra.mxu0 %v120_v35  ;;  %173 = vmatpush.msra.mxu1 %v137_v60  ;;  %v117_v21 = vld [vmem:[#allocation7 + $0x8] sm:$0xff]  ;;  %v358_v23 = vld [vmem:[%s605_s4] ss:$0 sm:$0xff]  ;;  %s336_s4 = sshll.u32 %s609_s8, 4  ;;  %s337_s4 = int_to_ptr.hbm [resolvable:$true] %s336_s4 }
  0x34   :  { %224 = vmatpush.msra.mxu2 %v195_v38  ;;  %273 = vmatpush.msra.mxu3 %v244_v46  ;;  %v359_v27 = vld [vmem:[%s608_s7] ss:$0 sm:$0xff] }
  0x35   :  { %162 = vmatpush.msra.mxu0 %v118_v39  ;;  %174 = vmatpush.msra.mxu1 %v135_v62  ;;  %v360_v29 = vld [vmem:[%s607_s6] ss:$0 sm:$0xff] }
  0x36   :  { %225 = vmatpush.msra.mxu2 %v194_v41  ;;  %274 = vmatpush.msra.mxu3 %v243_v47 }
  0x37   :  { %163 = vmatpush.msra.mxu0 %v116_v43  ;;  %226 = vmatmul.f32.vlgmr.msra.gmra.mxu2 %v193_v42 }
  0x38   :  { %164 = vmatmul.f32.vlgmr.msra.gmra.mxu0 %v583_v36  ;;  %275 = vmatpush.msra.mxu3 %v242_v48 }
  0x39   :  { %302 = vmatpush.msrb.mxu0 %v297_v51  ;;  %175 = vmatpush.msra.mxu1 %v133_v0 }
  0x3a   :  { %276 = vmatpush.msra.mxu3 %v241_v49 }
  0x3b   :  { %303 = vmatpush.msrb.mxu0 %v296_v53  ;;  %176 = vmatpush.msra.mxu1 %v131_v2 }
  0x3d   :  { %304 = vmatpush.msrb.mxu0 %v295_v55  ;;  %177 = vmatpush.msra.mxu1 %v129_v4 }
  0x3f   :  { %305 = vmatpush.msrb.mxu0 %v294_v57  ;;  %178 = vmatpush.msra.mxu1 %v127_v6 }
  0x41   :  { %306 = vmatpush.msrb.mxu0 %v293_v59  ;;  %179 = vmatpush.msra.mxu1 %v125_v8 }
  0x43   :  { %307 = vmatpush.msrb.mxu0 %v292_v61  ;;  %180 = vmatpush.msra.mxu1 %v123_v11 }
  0x45   :  { %308 = vmatpush.msrb.mxu0 %v291_v63  ;;  %181 = vmatpush.msra.mxu1 %v121_v14 }
  0x47   :  { %309 = vmatpush.msrb.mxu0 %v290_v1  ;;  %182 = vmatpush.msra.mxu1 %v119_v19 }
  0x49   :  { %310 = vmatpush.msrb.mxu0 %v289_v3  ;;  %183 = vmatpush.msra.mxu1 %v117_v21 }
  0x4a   :  { %184 = vmatmul.f32.vlgmr.msra.gmra.mxu1 %v583_v36 }
  0x4b   :  { %311 = vmatpush.msrb.mxu0 %v288_v5 }
  0x4d   :  { %312 = vmatpush.msrb.mxu0 %v287_v7 }
  0x4f   :  { %313 = vmatpush.msrb.mxu0 %v286_v9 }
  0x51   :  { %314 = vmatpush.msrb.mxu0 %v285_v12 }
  0x53   :  { %315 = vmatpush.msrb.mxu0 %v284_v18 }
  0x55   :  { %316 = vmatpush.msrb.mxu0 %v283_v20 }
  0x57   :  { %317 = vmatpush.msrb.mxu0 %v282_v22 }
  0xb5   :  { %v165_v10 = vpop.f32.mrf.mxu0 }
  0xb6   :  { %v238_v13 = vmul.f32 %v165_v10, %v165_v10 }
  0xba   :  { %v227_v15 = vpop.f32.mrf.mxu2 }
  0xbb   :  { %v239_v16 = vsub.f32 %v238_v13, %v227_v15 }
  0xbd   :  { %v240_v17 = vmul.f32 0.5, %v239_v16 }
  0xbf   :  { %277 = vmatmul.f32.vlgmr.msra.gmra.mxu3 %v240_v17 }
  0xc7   :  { %v185_v28 = vpop.f32.mrf.mxu1 }
  0xc8   :  { %v326_v30 = vadd.f32 %v359_v27, %v185_v28 }
 0x142   :  { %v278_v24 = vpop.f32.mrf.mxu3 }
 0x143   :  { %v279_v25 = vadd.f32 %v358_v23, %v278_v24 }
 0x145   :  { %v281_v26 = vmax.f32 %v279_v25, 0.0 }
 0x147   :  { %318 = vmatmul.f32.vlgmr.msrb.gmra.mxu0 %v281_v26 }
 0x1c4   :  { %v319_v31 = vpop.f32.mrf.mxu0 }
 0x1c5   :  { %v320_v32 = vadd.f32 %v360_v29, %v319_v31 }
 0x1c7   :  { %v327_v33 = vadd.f32 %v326_v30, %v320_v32 }
 0x1c9   :  { %328 = vst [vmem:[#allocation13] sm:$0xff] %v327_v33 }
 0x1ca   :  { %339 = dma.vmem_to_hbm [thread:$0]  %s335_s14, 128, %s337_s4, [#allocation6]  }
 0x1cb   :  { %511 = dma.done.wait [#allocation6], 128  }
 0x1cc   :  { %512 = vsyncadd [#allocation6], 4294967168 }
 0x1cd   :  { %344 = vsyncpa [#allocation5], 1 }
 0x1ce   :  { %345 = vsyncpa [#allocation8], 1 }
 0x1cf   :  { %346 = vsyncpa [#allocation11], 1 }
 0x1d0   :  { %347 = vsyncpa [#allocation6], 1 }

</bundles_post_ra>
